<compile_context>
chip_gen: v6e
topology: v6e:2x2x1
jax: 0.10.0
libtpu: 0.0.40
codegen_flags: <defaults>
</compile_context>

<pallas_src>
import functools

import jax
import jax.numpy as jnp
from jax import lax
from jax.experimental import pallas as pl
from jax.experimental.pallas import tpu as pltpu

_LANES = 128


def _round_up(x: int, m: int) -> int:
    return (x + m - 1) // m * m


def _squeeze_kernel(x_ref, gamma_ref, o_ref, acc_ref, *,
                    hw_total: int, hw_tile: int, n_hw_tiles: int):
    """
    x_ref:     (r_tile, hw_tile)   rows (= B*C collapsed) x spatial chunk
    gamma_ref: (r_tile, 1)         f32 per-row scale, already folded with 1/(H*W)
    o_ref:     (r_tile, 1)         output tile
    acc_ref:   (r_tile, 128)       f32 lane-parallel partial-sum accumulator
    """
    k = pl.program_id(1)

    @pl.when(k == 0)
    def _init():
        acc_ref[...] = jnp.zeros_like(acc_ref)

    def _accumulate(valid_len: int):
        # Lane-parallel accumulation of the first `valid_len` lanes of this tile.
        # Pure VPU adds; no cross-lane (XLU) work in the hot loop.
        n_full = valid_len // _LANES
        rem = valid_len - n_full * _LANES

        if n_full > 0:
            r_tile = acc_ref.shape[0]
            vregs_per_chunk = max(1, r_tile // 8)
            # Partial unroll so scalar loop overhead stays small vs. the vector
            # loads/adds, without exploding code size for wide row tiles.
            unroll = int(max(1, min(n_full, 16, max(2, 64 // vregs_per_chunk))))

            def body(j, acc):
                start = pl.multiple_of(j * _LANES, _LANES)
                chunk = x_ref[:, pl.ds(start, _LANES)].astype(jnp.float32)
                return acc + chunk

            acc_ref[...] = lax.fori_loop(0, n_full, body, acc_ref[...],
                                         unroll=unroll)

        if rem > 0:
            # Sub-128-lane tail (only happens once per row tile: either a single
            # spatial step with HW % 128 != 0, or the last ragged spatial tile).
            tail = x_ref[:, pl.ds(n_full * _LANES, rem)].astype(jnp.float32)
            acc_ref[:, pl.ds(0, rem)] = acc_ref[:, pl.ds(0, rem)] + tail

    # Valid lane count of the last spatial tile is static -> no runtime masking.
    last_valid = hw_total - (n_hw_tiles - 1) * hw_tile
    if last_valid == hw_tile:
        _accumulate(hw_tile)
    else:
        @pl.when(k != n_hw_tiles - 1)
        def _body():
            _accumulate(hw_tile)

        @pl.when(k == n_hw_tiles - 1)
        def _body_last():
            _accumulate(last_valid)

    @pl.when(k == n_hw_tiles - 1)
    def _finalize():
        # One cross-lane reduction per row tile, then scale + cast + store.
        total = jnp.sum(acc_ref[...], axis=-1, keepdims=True)      # (r_tile, 1) f32
        o_ref[...] = (total * gamma_ref[...]).astype(o_ref.dtype)


def squeeze_forward(x_nchw: jax.Array, gamma: jax.Array,
                    *, target_tile_bytes: int = 4 * 1024 * 1024) -> jax.Array:
    """x_nchw: (B, C, H, W); gamma: (C,). Returns (B, C) = gamma * mean(x, axis=(2, 3))."""
    B, C, H, W = x_nchw.shape
    assert gamma.shape == (C,)
    HW = H * W
    R = B * C
    in_itemsize = jnp.dtype(x_nchw.dtype).itemsize
    out_dtype = x_nchw.dtype

    # ---- Row (B*C) tiling ------------------------------------------------------
    if R <= 256:
        r_tile = R                                # single tile; block == full dim is legal
    else:
        # >= 2 lane-/sublane-aligned row tiles so v7x's 2nd TensorCore isn't idle.
        r_tile = min(512, _round_up(pl.cdiv(R, 2), _LANES))
    n_r = pl.cdiv(R, r_tile)

    # ---- Spatial tiling --------------------------------------------------------
    # Multiple of 128 lanes, sized so one input tile is ~target_tile_bytes
    # (x2 for double buffering stays inside every generation's scoped VMEM).
    hw_cap = max(_LANES,
                 (target_tile_bytes // max(1, r_tile * in_itemsize)) // _LANES * _LANES)
    hw_tile = HW if HW <= hw_cap else hw_cap
    n_hw = pl.cdiv(HW, hw_tile)

    x_rows = x_nchw.reshape(R, HW)                                   # free metadata reshape
    # Fold 1/(H*W) into the per-row scale; O(B*C) wrapper-side work.
    gamma_rows = jnp.tile(gamma.astype(jnp.float32) * (1.0 / HW), B).reshape(R, 1)

    kernel = functools.partial(_squeeze_kernel,
                               hw_total=HW, hw_tile=hw_tile, n_hw_tiles=n_hw)

    cost = pl.CostEstimate(
        flops=R * HW + R,
        transcendentals=0,
        bytes_accessed=R * HW * in_itemsize
        + R * jnp.dtype(out_dtype).itemsize
        + R * 4,
    )

    out = pl.pallas_call(
        kernel,
        out_shape=jax.ShapeDtypeStruct((R, 1), out_dtype),
        grid=(n_r, n_hw),
        in_specs=[
            pl.BlockSpec((r_tile, hw_tile), lambda r, k: (r, k)),
            pl.BlockSpec((r_tile, 1), lambda r, k: (r, 0)),
        ],
        out_specs=pl.BlockSpec((r_tile, 1), lambda r, k: (r, 0)),
        scratch_shapes=[pltpu.VMEM((r_tile, _LANES), jnp.float32)],
        compiler_params=pltpu.CompilerParams(
            dimension_semantics=("parallel", "arbitrary"),
        ),
        cost_estimate=cost,
    )(x_rows, gamma_rows)

    return out.reshape(B, C)


if __name__ == "__main__":
    key = jax.random.PRNGKey(0)
    k0, k1, k2, k3 = jax.random.split(key, 4)

    # --- Test 1: small shapes consistent with the module's forward pass --------
    B, C, H, W = 2, 4, 16, 16
    init_scale = 1.0
    x = jax.random.normal(k0, (B, C, H, W), dtype=jnp.float32)
    gamma = init_scale * jnp.ones((C,), dtype=jnp.float32)   # LayerScaler init

    out = jax.block_until_ready(squeeze_forward(x, gamma))
    ref = jnp.mean(x, axis=(2, 3)) * gamma[None, :]
    assert out.shape == (B, C)
    assert jnp.allclose(out, ref, atol=1e-5, rtol=1e-5)

    # --- Test 2: ragged spatial extent + tiny tile budget -> multi-step spatial
    # accumulation with a ragged (statically-shortened) last spatial tile. -------
    x2 = jax.random.normal(k1, (B, C, 15, 15), dtype=jnp.float32)
    out2 = jax.block_until_ready(squeeze_forward(x2, gamma, target_tile_bytes=4096))
    ref2 = jnp.mean(x2, axis=(2, 3)) * gamma[None, :]
    assert jnp.allclose(out2, ref2, atol=1e-5, rtol=1e-5)

    # --- Test 3: bf16 inputs (f32 accumulation path, sub-128-lane spatial tail) -
    x3 = jax.random.normal(k2, (1, 16, 8, 8), dtype=jnp.bfloat16)
    gamma3 = jnp.linspace(0.5, 1.5, 16, dtype=jnp.float32)
    out3 = jax.block_until_ready(squeeze_forward(x3, gamma3))
    ref3 = jnp.mean(x3.astype(jnp.float32), axis=(2, 3)) * gamma3[None, :]
    assert jnp.allclose(out3.astype(jnp.float32), ref3, atol=1e-2, rtol=1e-2)

    # --- Test 4: R = B*C > 256 -> multiple lane-aligned row tiles, ragged last
    # row tile (padded rows discarded by the masked output writeback). -----------
    x4 = jax.random.normal(k3, (2, 160, 8, 8), dtype=jnp.float32)
    gamma4 = jnp.linspace(0.9, 1.1, 160, dtype=jnp.float32)
    out4 = jax.block_until_ready(squeeze_forward(x4, gamma4))
    ref4 = jnp.mean(x4, axis=(2, 3)) * gamma4[None, :]
    assert jnp.allclose(out4, ref4, atol=1e-5, rtol=1e-5)

    print("KERNEL_OK")
</pallas_src>

<mosaic_0001>
module attributes {stable_mosaic.version = 11 : i64} {
  func.func @_squeeze_kernel(%arg0: i32, %arg1: i32, %arg2: memref<8x256xf32, #tpu.memory_space<vmem>>, %arg3: memref<8x1xf32, #tpu.memory_space<vmem>>, %arg4: memref<8x1xf32, #tpu.memory_space<vmem>>, %arg5: memref<8x128xf32, #tpu.memory_space<vmem>>) attributes {dimension_semantics = [#tpu.dimension_semantics<parallel>, #tpu.dimension_semantics<arbitrary>], iteration_bounds = array<i64: 1, 1>, scalar_prefetch = 0 : i64, scratch_operands = 1 : i64, tpu.core_type = #tpu.core_type<tc>, window_params = [{transform_indices = @transform_0, window_bounds = array<i64: 8, 256>}, {transform_indices = @transform_1, window_bounds = array<i64: 8, 1>}, {transform_indices = @transform_2, window_bounds = array<i64: 8, 1>}]} {
    %c0_i32 = arith.constant 0 : i32
    %0 = arith.cmpi eq, %arg1, %c0_i32 : i32
    %1 = arith.extui %0 : i1 to i32
    %c0_i32_0 = arith.constant 0 : i32
    %2 = arith.cmpi ne, %1, %c0_i32_0 : i32
    scf.if %2 {
      %cst = arith.constant 0.000000e+00 : f32
      %18 = vector.broadcast %cst : f32 to vector<8x128xf32>
      %c0_10 = arith.constant 0 : index
      %c0_11 = arith.constant 0 : index
      %19 = vector.load %arg5[%c0_10, %c0_11] : memref<8x128xf32, #tpu.memory_space<vmem>>, vector<8x128xf32>
      tpu.vector_store %arg5[%c0_10, %c0_11], %18 {strides = array<i32>} : memref<8x128xf32, #tpu.memory_space<vmem>>, vector<8x128xf32>,
    } else {
    }
    %c0 = arith.constant 0 : index
    %c0_1 = arith.constant 0 : index
    %3 = vector.load %arg5[%c0, %c0_1] : memref<8x128xf32, #tpu.memory_space<vmem>>, vector<8x128xf32>
    %c0_i32_2 = arith.constant 0 : i32
    %c128_i32 = arith.constant 128 : i32
    %4 = arith.muli %c0_i32_2, %c128_i32 : i32
    %5 = tpu.assume_multiple %4, 128 : i32
    %c0_3 = arith.constant 0 : index
    %6 = arith.index_cast %5 : i32 to index
    %7 = vector.load %arg2[%c0_3, %6] : memref<8x256xf32, #tpu.memory_space<vmem>>, vector<8x128xf32>
    %8 = arith.addf %3, %7 : vector<8x128xf32>
    %c1_i32 = arith.constant 1 : i32
    %c128_i32_4 = arith.constant 128 : i32
    %9 = arith.muli %c1_i32, %c128_i32_4 : i32
    %10 = tpu.assume_multiple %9, 128 : i32
    %c0_5 = arith.constant 0 : index
    %11 = arith.index_cast %10 : i32 to index
    %12 = vector.load %arg2[%c0_5, %11] : memref<8x256xf32, #tpu.memory_space<vmem>>, vector<8x128xf32>
    %13 = arith.addf %8, %12 : vector<8x128xf32>
    %c2_i32 = arith.constant 2 : i32
    %c0_6 = arith.constant 0 : index
    %c0_7 = arith.constant 0 : index
    %14 = vector.load %arg5[%c0_6, %c0_7] : memref<8x128xf32, #tpu.memory_space<vmem>>, vector<8x128xf32>
    tpu.vector_store %arg5[%c0_6, %c0_7], %13 {strides = array<i32>} : memref<8x128xf32, #tpu.memory_space<vmem>>, vector<8x128xf32>,
    %c0_i32_8 = arith.constant 0 : i32
    %15 = arith.cmpi eq, %arg1, %c0_i32_8 : i32
    %16 = arith.extui %15 : i1 to i32
    %c0_i32_9 = arith.constant 0 : i32
    %17 = arith.cmpi ne, %16, %c0_i32_9 : i32
    scf.if %17 {
      %c0_10 = arith.constant 0 : index
      %c0_11 = arith.constant 0 : index
      %18 = vector.load %arg5[%c0_10, %c0_11] : memref<8x128xf32, #tpu.memory_space<vmem>>, vector<8x128xf32>
      %cst = arith.constant dense<0.000000e+00> : vector<8xf32>
      %19 = vector.multi_reduction <add>, %18, %cst [1] : vector<8x128xf32> to vector<8xf32>
      %20 = vector.shape_cast %19 : vector<8xf32> to vector<8x1xf32>
      %c0_12 = arith.constant 0 : index
      %c0_13 = arith.constant 0 : index
      %21 = vector.load %arg3[%c0_12, %c0_13] : memref<8x1xf32, #tpu.memory_space<vmem>>, vector<8x1xf32>
      %22 = arith.mulf %20, %21 : vector<8x1xf32>
      %c0_14 = arith.constant 0 : index
      %c0_15 = arith.constant 0 : index
      %23 = vector.load %arg4[%c0_14, %c0_15] : memref<8x1xf32, #tpu.memory_space<vmem>>, vector<8x1xf32>
      tpu.vector_store %arg4[%c0_14, %c0_15], %22 {strides = array<i32>} : memref<8x1xf32, #tpu.memory_space<vmem>>, vector<8x1xf32>,
    } else {
    }
    return
  }
  func.func @transform_0(%arg0: i32, %arg1: i32) -> (i32, i32) {
    %c0_i32 = arith.constant 0 : i32
    return %arg0, %arg1 : i32, i32
  }
  func.func @transform_1(%arg0: i32, %arg1: i32) -> (i32, i32) {
    %c0_i32 = arith.constant 0 : i32
    %c0_i32_0 = arith.constant 0 : i32
    return %arg0, %c0_i32 : i32, i32
  }
  func.func @transform_2(%arg0: i32, %arg1: i32) -> (i32, i32) {
    %c0_i32 = arith.constant 0 : i32
    %c0_i32_0 = arith.constant 0 : i32
    return %arg0, %c0_i32 : i32, i32
  }
}

</mosaic_0001>

<bundles_post_ra>
// kernel: tpu_custom_call.1
= control target key start
LH: loop header
LB: loop body
LE: loop exit
PB: predicated region body
PF: predicated region fallthrough
CT: control target
= control target key end

     0   :  { %7 = vsyncpa [#allocation4], 0  ;;  %s73_s9 = smov [#allocation3]   ;;  %s98_s0 = inlined_call_operand.hbm [shape: f32[8,256], index: 0, kind: input, shape index: {}]   ;;  %s99_s1 = inlined_call_operand.vmem [shape: f32[8,1], index: 1, kind: input, shape index: {}]   ;;  %s100_s2 = inlined_call_operand.vmem [shape: f32[8,1], index: 2, kind: output, shape index: {}]  }
   0x1   :  { %s14_s10 = sshll.u32 %s73_s9, 4  ;;  %s15_s10 = int_to_ptr.vmem [resolvable:$true] %s14_s10 }
   0x2   :  { %s59_s11 = scalar_lea.vmem %s15_s10, 256  ;;  %p64_p1 = scmp.lt.s32.totalorder %s15_s10, %s15_s10 }
   0x3   :  { %p60_p0 = scmp.ne.s32.totalorder %s15_s10, %s59_s11  ;;  %p65_p2 = scmp.lt.s32.totalorder %s59_s11, %s59_s11 }
   0x5   :  { %p66_p3 = por %p65_p2, %p64_p1 }
   0x7   :  { %p67_p4 = pnand %p66_p3, %p60_p0 }
   0x9   :  { %70 = shalt.err (!%p67_p4)
}
   0xa   :  { %17 = dma.hbm_to_vmem [thread:$0]  %s98_s0, 256, %s15_s10, [#allocation4]  }
   0xb   :  { %71 = dma.done.wait [#allocation4], 256  }
   0xc   :  { %72 = vsyncadd [#allocation4], 4294967040  ;;  %v29_v0 = vld [vmem:[#allocation3] sm:$0xff]  ;;  %v32_v1 = vld [vmem:[#allocation3 + $0x8] sm:$0xff]  ;;  %vm43_vm0 = vcmask 7168  }
   0xd   :  { %v33_v2 = vadd.f32 %v32_v1, %v29_v0  ;;  %v41_v3 = vld [vmem:[%s99_s1] sm:$0xff] }
   0xf   :  { %39 = vadd.xlane.f32.xlu0 %v33_v2 }
  0x98   :  { %v40_v4 = vpop.xlane.xlu0 %39 }
  0x99   :  { %v42_v5 = vmul.f32 %v41_v3, %v40_v4 }
  0x9b   :  { %44 = vst.msk [vmem:[%s100_s2] sm:$0xff] %vm43_vm0, %v42_v5 }
  0x9c   :  { %49 = vsyncpa [#allocation4], 1 }

</bundles_post_ra>
